<compile_context>
chip_gen: v7x
topology: tpu7x:2x2x1
jax: 0.10.0
libtpu: 0.0.40
codegen_flags: <defaults>
</compile_context>

<pallas_src>
import jax
import jax.numpy as jnp
from jax.experimental import pallas as pl
from jax.experimental.pallas import tpu as pltpu


HIDDEN = 512  # fixed by the module definition


def _round_up(x: int, m: int) -> int:
    return (x + m - 1) // m * m


def decoder_kernel(z_ref, w1_ref, b1_ref, w2_ref, b2_ref, o_ref):
    # Fused MLP tile: z(f32) -> bf16 -> MXU -> +b1 -> ReLU -> bf16 -> MXU -> +b2.
    z_bf = z_ref[...].astype(jnp.bfloat16)          # in-kernel cast: no extra HBM pass
    h = jnp.dot(z_bf, w1_ref[...], preferred_element_type=jnp.float32)
    h = jnp.maximum(h + b1_ref[...], 0.0)           # f32 epilogue on the VPU
    out = jnp.dot(h.astype(jnp.bfloat16), w2_ref[...],
                  preferred_element_type=jnp.float32)
    o_ref[...] = (out + b2_ref[...]).astype(o_ref.dtype)


def _pick_tile_b(B: int) -> int:
    """Chip-aware batch tile.  v7x has 2 TensorCores -> guarantee >=2 grid
    steps so the 'parallel' axis can be sharded across both cores; single-TC
    chips (v5e/v6e) just want the biggest tile that amortizes per-step cost."""
    try:
        kind = jax.devices()[0].device_kind.lower()
    except Exception:  # pragma: no cover - defensive
        kind = ""
    if ("v7" in kind) or ("tpu7" in kind):
        tile = min(256, _round_up(-(-B // 2), 8))   # <= ceil(B/2), sublane aligned
    else:
        tile = min(512, _round_up(B, 8))
    return max(8, min(tile, _round_up(B, 8)))


def _vmem_estimate(tile_b: int, z_dim: int, x_pad: int, out_bytes: int) -> int:
    return (
        2 * tile_b * z_dim * 4                        # z tiles (f32, double-buffered)
        + 2 * tile_b * x_pad * out_bytes              # out tiles (double-buffered)
        + 2 * (z_dim * HIDDEN + HIDDEN * x_pad) * 2   # bf16 weights (Pallas dbl-buffers)
        + 2 * (HIDDEN + x_pad) * 4                    # biases (f32)
        + tile_b * HIDDEN * 4                         # f32 hidden activation
        + tile_b * (z_dim + HIDDEN) * 2               # in-kernel bf16 casts of z and h
        + tile_b * x_pad * 4                          # f32 accumulator of second GEMM
    )


def _decoder_pallas(z, w1b, b1p, w2b, b2p, *, out_dtype):
    B, z_dim = z.shape
    x_pad = w2b.shape[1]
    out_bytes = jnp.dtype(out_dtype).itemsize

    # Tile-derived VMEM budget (safe under v7x's 64 MiB per-core VMEM).
    tile_b = _pick_tile_b(B)
    budget = 44 << 20
    while _vmem_estimate(tile_b, z_dim, x_pad, out_bytes) > budget and tile_b > 8:
        tile_b = max(8, tile_b // 2)
    # TODO(synk): add an x_pad (N) grid axis if the resident weights alone ever
    # exceed the VMEM budget (not reachable for this module's HIDDEN=512).

    est = _vmem_estimate(tile_b, z_dim, x_pad, out_bytes)
    vmem_limit = int(min(max(2 * est, 16 << 20), 48 << 20))

    grid = (pl.cdiv(B, tile_b),)   # ragged last tile handled by Pallas, no B padding

    return pl.pallas_call(
        decoder_kernel,
        out_shape=jax.ShapeDtypeStruct((B, x_pad), out_dtype),
        grid_spec=pltpu.PrefetchScalarGridSpec(
            num_scalar_prefetch=0,
            grid=grid,
            in_specs=[
                pl.BlockSpec((tile_b, z_dim), lambda i: (i, 0)),   # z tile (f32, full K)
                pl.BlockSpec((z_dim, HIDDEN), lambda i: (0, 0)),   # W1 (resident, bf16)
                pl.BlockSpec((1, HIDDEN), lambda i: (0, 0)),       # b1 (f32)
                pl.BlockSpec((HIDDEN, x_pad), lambda i: (0, 0)),   # W2 (resident, bf16)
                pl.BlockSpec((1, x_pad), lambda i: (0, 0)),        # b2 (f32)
            ],
            out_specs=pl.BlockSpec((tile_b, x_pad), lambda i: (i, 0)),
        ),
        compiler_params=pltpu.CompilerParams(
            dimension_semantics=("parallel",),
            vmem_limit_bytes=vmem_limit,
        ),
    )(z, w1b, b1p, w2b, b2p)


def make_decoder(w1, b1, w2, b2, *, out_dtype=jnp.float32, return_padded=False):
    """One-time weight prep (hoisted out of the per-call path), returns a jitted
    forward: z (B, z_dim) f32 -> relu(z @ w1 + b1) @ w2 + b2."""
    z_dim, hidden = w1.shape
    assert hidden == HIDDEN and w2.shape == (HIDDEN, w2.shape[1])
    x_dim = w2.shape[1]
    x_pad = _round_up(x_dim, 128)

    # bf16 MXU operands; only the output feature dim is padded (lane-dense stores).
    w1b = jnp.asarray(w1, jnp.bfloat16)
    b1p = jnp.asarray(b1, jnp.float32).reshape(1, HIDDEN)
    w2b = jnp.zeros((HIDDEN, x_pad), jnp.bfloat16).at[:, :x_dim].set(
        jnp.asarray(w2, jnp.bfloat16))
    b2p = jnp.zeros((1, x_pad), jnp.float32).at[:, :x_dim].set(
        jnp.asarray(b2, jnp.float32))

    @jax.jit
    def forward(z):
        out = _decoder_pallas(z, w1b, b1p, w2b, b2p, out_dtype=out_dtype)
        if return_padded:
            return out            # lane-dense (B, x_pad); let the consumer slice/fuse
        return out[:, :x_dim]     # module-exact shape (no-op when x_dim % 128 == 0)

    return forward


def init_linear(key, fan_in, fan_out):
    # PyTorch-default-style init: U(-1/sqrt(fan_in), 1/sqrt(fan_in))
    kw, kb = jax.random.split(key)
    bound = 1.0 / jnp.sqrt(fan_in)
    w = jax.random.uniform(kw, (fan_in, fan_out), jnp.float32, -bound, bound)
    b = jax.random.uniform(kb, (fan_out,), jnp.float32, -bound, bound)
    return w, b


if __name__ == "__main__":
    key = jax.random.PRNGKey(0)
    k_z, k_l1, k_l2 = jax.random.split(key, 3)

    # Small, module-consistent shapes; x_dim deliberately not a multiple of 128
    # to exercise the lane-dense padding path.
    B, z_dim, x_dim = 8, 64, 200

    z = jax.random.normal(k_z, (B, z_dim), jnp.float32)
    w1, b1 = init_linear(k_l1, z_dim, HIDDEN)
    w2, b2 = init_linear(k_l2, HIDDEN, x_dim)

    decoder = make_decoder(w1, b1, w2, b2)   # weight prep amortized across calls
    out = jax.block_until_ready(decoder(z))
    assert out.shape == (B, x_dim)
    assert out.dtype == jnp.float32

    # bf16-emulated reference (same math as the kernel) -> tight tolerance.
    zb, w1b, w2b = (a.astype(jnp.bfloat16) for a in (z, w1, w2))
    h_ref = jnp.maximum(
        jnp.dot(zb, w1b, preferred_element_type=jnp.float32) + b1, 0.0)
    ref_bf16 = jnp.dot(h_ref.astype(jnp.bfloat16), w2b,
                       preferred_element_type=jnp.float32) + b2
    assert jnp.allclose(out, ref_bf16, atol=2e-3, rtol=2e-3)

    # Full f32 reference -> relaxed tolerance (bf16 MXU operands).
    ref_f32 = jnp.maximum(z @ w1 + b1, 0.0) @ w2 + b2
    assert jnp.allclose(out, ref_f32, atol=5e-2, rtol=5e-2)

    print("KERNEL_OK")
</pallas_src>

<mosaic_0001>
module attributes {stable_mosaic.version = 11 : i64} {
  func.func @decoder_kernel(%arg0: i32, %arg1: memref<8x64xf32, #tpu.memory_space<vmem>>, %arg2: memref<64x512xbf16, #tpu.memory_space<vmem>>, %arg3: memref<1x512xf32, #tpu.memory_space<vmem>>, %arg4: memref<512x256xbf16, #tpu.memory_space<vmem>>, %arg5: memref<1x256xf32, #tpu.memory_space<vmem>>, %arg6: memref<8x256xf32, #tpu.memory_space<vmem>>) attributes {dimension_semantics = [#tpu.dimension_semantics<parallel>], iteration_bounds = array<i64: 1>, scalar_prefetch = 0 : i64, scratch_operands = 0 : i64, tpu.core_type = #tpu.core_type<tc>, window_params = [{transform_indices = @transform_0, window_bounds = array<i64: 8, 64>}, {pipeline_mode = #tpu.pipeline_mode<synchronous>, transform_indices = @transform_1, window_bounds = array<i64: 64, 512>}, {pipeline_mode = #tpu.pipeline_mode<synchronous>, transform_indices = @transform_2, window_bounds = array<i64: 1, 512>}, {pipeline_mode = #tpu.pipeline_mode<synchronous>, transform_indices = @transform_3, window_bounds = array<i64: 512, 256>}, {pipeline_mode = #tpu.pipeline_mode<synchronous>, transform_indices = @transform_4, window_bounds = array<i64: 1, 256>}, {transform_indices = @transform_5, window_bounds = array<i64: 8, 256>}]} {
    %c0 = arith.constant 0 : index
    %c0_0 = arith.constant 0 : index
    %0 = vector.load %arg1[%c0, %c0_0] : memref<8x64xf32, #tpu.memory_space<vmem>>, vector<8x64xf32>
    %1 = arith.truncf %0 : vector<8x64xf32> to vector<8x64xbf16>
    %c0_1 = arith.constant 0 : index
    %c0_2 = arith.constant 0 : index
    %2 = vector.load %arg2[%c0_1, %c0_2] : memref<64x512xbf16, #tpu.memory_space<vmem>>, vector<64x512xbf16>
    %cst = arith.constant dense<0.000000e+00> : vector<8x512xf32>
    %3 = tpu.matmul %1, %2, %cst {dimension_numbers = #tpu.dot_dimension_numbers<[1], [0], [0], [1], [0, 0, 1, 1], [], []>} : vector<8x64xbf16>, vector<64x512xbf16>, vector<8x512xf32> -> vector<8x512xf32>
    %c0_3 = arith.constant 0 : index
    %c0_4 = arith.constant 0 : index
    %4 = vector.load %arg3[%c0_3, %c0_4] : memref<1x512xf32, #tpu.memory_space<vmem>>, vector<1x512xf32>
    %5 = vector.broadcast %4 : vector<1x512xf32> to vector<8x512xf32>
    %6 = arith.addf %3, %5 : vector<8x512xf32>
    %cst_5 = arith.constant 0.000000e+00 : f32
    %7 = vector.broadcast %cst_5 : f32 to vector<8x512xf32>
    %8 = arith.maximumf %6, %7 : vector<8x512xf32>
    %9 = arith.truncf %8 : vector<8x512xf32> to vector<8x512xbf16>
    %c0_6 = arith.constant 0 : index
    %c0_7 = arith.constant 0 : index
    %10 = vector.load %arg4[%c0_6, %c0_7] : memref<512x256xbf16, #tpu.memory_space<vmem>>, vector<512x256xbf16>
    %cst_8 = arith.constant dense<0.000000e+00> : vector<8x256xf32>
    %11 = tpu.matmul %9, %10, %cst_8 {dimension_numbers = #tpu.dot_dimension_numbers<[1], [0], [0], [1], [0, 0, 1, 1], [], []>} : vector<8x512xbf16>, vector<512x256xbf16>, vector<8x256xf32> -> vector<8x256xf32>
    %c0_9 = arith.constant 0 : index
    %c0_10 = arith.constant 0 : index
    %12 = vector.load %arg5[%c0_9, %c0_10] : memref<1x256xf32, #tpu.memory_space<vmem>>, vector<1x256xf32>
    %13 = vector.broadcast %12 : vector<1x256xf32> to vector<8x256xf32>
    %14 = arith.addf %11, %13 : vector<8x256xf32>
    %c0_11 = arith.constant 0 : index
    %c0_12 = arith.constant 0 : index
    %15 = vector.load %arg6[%c0_11, %c0_12] : memref<8x256xf32, #tpu.memory_space<vmem>>, vector<8x256xf32>
    tpu.vector_store %arg6[%c0_11, %c0_12], %14 {strides = array<i32>} : memref<8x256xf32, #tpu.memory_space<vmem>>, vector<8x256xf32>,
    return
  }
  func.func @transform_0(%arg0: i32) -> (i32, i32) {
    %c0_i32 = arith.constant 0 : i32
    %c0_i32_0 = arith.constant 0 : i32
    return %arg0, %c0_i32 : i32, i32
  }
  func.func @transform_1(%arg0: i32) -> (i32, i32) {
    %c0_i32 = arith.constant 0 : i32
    %c0_i32_0 = arith.constant 0 : i32
    %c0_i32_1 = arith.constant 0 : i32
    return %c0_i32, %c0_i32_0 : i32, i32
  }
  func.func @transform_2(%arg0: i32) -> (i32, i32) {
    %c0_i32 = arith.constant 0 : i32
    %c0_i32_0 = arith.constant 0 : i32
    %c0_i32_1 = arith.constant 0 : i32
    return %c0_i32, %c0_i32_0 : i32, i32
  }
  func.func @transform_3(%arg0: i32) -> (i32, i32) {
    %c0_i32 = arith.constant 0 : i32
    %c0_i32_0 = arith.constant 0 : i32
    %c0_i32_1 = arith.constant 0 : i32
    return %c0_i32, %c0_i32_0 : i32, i32
  }
  func.func @transform_4(%arg0: i32) -> (i32, i32) {
    %c0_i32 = arith.constant 0 : i32
    %c0_i32_0 = arith.constant 0 : i32
    %c0_i32_1 = arith.constant 0 : i32
    return %c0_i32, %c0_i32_0 : i32, i32
  }
  func.func @transform_5(%arg0: i32) -> (i32, i32) {
    %c0_i32 = arith.constant 0 : i32
    %c0_i32_0 = arith.constant 0 : i32
    return %arg0, %c0_i32 : i32, i32
  }
}

</mosaic_0001>

<bundles_post_ra>
// kernel: forward.1
= control target key start
LH: loop header
LB: loop body
LE: loop exit
PB: predicated region body
PF: predicated region fallthrough
CT: control target
= control target key end

     0   :  { %v962_v2 = vmov 0   ;;  %vm142_vm0 = vcmask 523264   ;;  %s1255_s0 = inlined_call_operand.vmem [shape: f32[8,64], index: 0, kind: input, shape index: {}]   ;;  %s1256_s1 = inlined_call_operand.vmem [shape: bf16[64,512], index: 1, kind: input, shape index: {}]   ;;  %s1257_s2 = inlined_call_operand.vmem [shape: f32[1,512], index: 2, kind: input, shape index: {}]   ;;  %s1258_s3 = inlined_call_operand.vmem [shape: bf16[512,256], index: 3, kind: input, shape index: {}]   ;;  %s1259_s4 = inlined_call_operand.vmem [shape: f32[1,256], index: 4, kind: input, shape index: {}]   ;;  %s1260_s5 = inlined_call_operand.hbm [shape: f32[8,256], index: 5, kind: output, shape index: {}]  }
   0x1   :  { %v818_v0 = vld [vmem:[%s1256_s1 + $0x4] ss:$16 sps:$4 sm:$0xff]   ;;  %v820_v1 = vld [vmem:[%s1256_s1 + $0xc] ss:$16 sps:$4 sm:$0xff]   ;;  %178 = vmatprep.mubr.bf16.mxu0 %v962_v2  ;;  %219 = vmatprep.mubr.bf16.mxu1 %v962_v2  ;;  %v822_v3 = vld [vmem:[%s1256_s1] ss:$16 sps:$4 sm:$0xff]  }
   0x2   :  { %146 = vmatprep.subr.bf16.mxu0 %v818_v0  ;;  %v823_v4 = vld [vmem:[%s1256_s1 + $0x8] ss:$16 sps:$4 sm:$0xff]   ;;  %187 = vmatprep.subr.bf16.mxu1 %v820_v1  ;;  %v824_v5 = vld [vmem:[%s1256_s1 + $0x24] ss:$16 sps:$4 sm:$0xff]   ;;  %v826_v6 = vld [vmem:[%s1256_s1 + $0x2c] ss:$16 sps:$4 sm:$0xff]  }
   0x3   :  { %147 = vmatpush1.bf16.msra.mxu0 %v822_v3  ;;  %188 = vmatpush1.bf16.msra.mxu1 %v823_v4  ;;  %v828_v7 = vld [vmem:[%s1256_s1 + $0x20] ss:$16 sps:$4 sm:$0xff]   ;;  %v829_v8 = vld [vmem:[%s1256_s1 + $0x28] ss:$16 sps:$4 sm:$0xff]   ;;  %v830_v9 = vld [vmem:[%s1256_s1 + $0x44] ss:$16 sps:$4 sm:$0xff]  }
   0x4   :  { %148 = vmatprep.subr.bf16.mxu0 %v824_v5  ;;  %189 = vmatprep.subr.bf16.mxu1 %v826_v6  ;;  %v832_v10 = vld [vmem:[%s1256_s1 + $0x4c] ss:$16 sps:$4 sm:$0xff]   ;;  %v834_v11 = vld [vmem:[%s1256_s1 + $0x40] ss:$16 sps:$4 sm:$0xff]   ;;  %v835_v12 = vld [vmem:[%s1256_s1 + $0x48] ss:$16 sps:$4 sm:$0xff]  }
   0x5   :  { %v836_v13 = vld [vmem:[%s1256_s1 + $0x64] ss:$16 sps:$4 sm:$0xff]   ;;  %v838_v14 = vld [vmem:[%s1256_s1 + $0x6c] ss:$16 sps:$4 sm:$0xff]   ;;  %v840_v15 = vld [vmem:[%s1256_s1 + $0x60] ss:$16 sps:$4 sm:$0xff]  }
   0x6   :  { %v841_v16 = vld [vmem:[%s1256_s1 + $0x68] ss:$16 sps:$4 sm:$0xff]   ;;  %v22_v17 = vld [vmem:[%s1255_s0] sm:$0xff]  ;;  %v850_v23 = vld [vmem:[%s1258_s3 + $0x14] ss:$8 sps:$4 sm:$0xff]  }
   0x7   :  { %149 = vmatpush1.bf16.msra.mxu0 %v828_v7  ;;  %190 = vmatpush1.bf16.msra.mxu1 %v829_v8  ;;  %v844_v18 = vld [vmem:[%s1258_s3 + $0x4] ss:$8 sps:$4 sm:$0xff]   ;;  %v23_v20 = vpack.c.bf16 %v22_v17, %v22_v17  ;;  %v842_v21 = vld [vmem:[%s1258_s3] ss:$8 sps:$4 sm:$0xff]   ;;  %v853_v24 = vld [vmem:[%s1258_s3 + $0x114] ss:$8 sps:$4 sm:$0xff]  }
   0x8   :  { %150 = vmatprep.subr.bf16.mxu0 %v830_v9  ;;  %191 = vmatprep.subr.bf16.mxu1 %v832_v10  ;;  %v847_v19 = vld [vmem:[%s1258_s3 + $0x104] ss:$8 sps:$4 sm:$0xff]   ;;  %v845_v22 = vld [vmem:[%s1258_s3 + $0x100] ss:$8 sps:$4 sm:$0xff]   ;;  %v848_v25 = vld [vmem:[%s1258_s3 + $0x10] ss:$8 sps:$4 sm:$0xff]  }
   0x9   :  { %v851_v26 = vld [vmem:[%s1258_s3 + $0x110] ss:$8 sps:$4 sm:$0xff]   ;;  %v856_v27 = vld [vmem:[%s1258_s3 + $0x24] ss:$8 sps:$4 sm:$0xff]   ;;  %v854_v29 = vld [vmem:[%s1258_s3 + $0x20] ss:$8 sps:$4 sm:$0xff]  }
   0xa   :  { %v859_v28 = vld [vmem:[%s1258_s3 + $0x124] ss:$8 sps:$4 sm:$0xff]   ;;  %v857_v30 = vld [vmem:[%s1258_s3 + $0x120] ss:$8 sps:$4 sm:$0xff]   ;;  %v862_v31 = vld [vmem:[%s1258_s3 + $0x34] ss:$8 sps:$4 sm:$0xff]  }
   0xb   :  { %151 = vmatpush1.bf16.msra.mxu0 %v834_v11  ;;  %192 = vmatpush1.bf16.msra.mxu1 %v835_v12  ;;  %v865_v32 = vld [vmem:[%s1258_s3 + $0x134] ss:$8 sps:$4 sm:$0xff]   ;;  %v860_v33 = vld [vmem:[%s1258_s3 + $0x30] ss:$8 sps:$4 sm:$0xff]   ;;  %v868_v35 = vld [vmem:[%s1258_s3 + $0x44] ss:$8 sps:$4 sm:$0xff]  }
   0xc   :  { %152 = vmatprep.subr.bf16.mxu0 %v836_v13  ;;  %193 = vmatprep.subr.bf16.mxu1 %v838_v14  ;;  %v863_v34 = vld [vmem:[%s1258_s3 + $0x130] ss:$8 sps:$4 sm:$0xff]   ;;  %v871_v36 = vld [vmem:[%s1258_s3 + $0x144] ss:$8 sps:$4 sm:$0xff]   ;;  %v866_v37 = vld [vmem:[%s1258_s3 + $0x40] ss:$8 sps:$4 sm:$0xff]  }
   0xd   :  { %v869_v38 = vld [vmem:[%s1258_s3 + $0x140] ss:$8 sps:$4 sm:$0xff]   ;;  %v874_v39 = vld [vmem:[%s1258_s3 + $0x54] ss:$8 sps:$4 sm:$0xff]   ;;  %v872_v41 = vld [vmem:[%s1258_s3 + $0x50] ss:$8 sps:$4 sm:$0xff]  }
   0xe   :  { %v877_v40 = vld [vmem:[%s1258_s3 + $0x154] ss:$8 sps:$4 sm:$0xff]   ;;  %v875_v42 = vld [vmem:[%s1258_s3 + $0x150] ss:$8 sps:$4 sm:$0xff]   ;;  %v880_v43 = vld [vmem:[%s1258_s3 + $0x64] ss:$8 sps:$4 sm:$0xff]  }
   0xf   :  { %153 = vmatpush1.bf16.msra.mxu0 %v840_v15  ;;  %194 = vmatpush1.bf16.msra.mxu1 %v841_v16  ;;  %v883_v44 = vld [vmem:[%s1258_s3 + $0x164] ss:$8 sps:$4 sm:$0xff]   ;;  %v878_v45 = vld [vmem:[%s1258_s3 + $0x60] ss:$8 sps:$4 sm:$0xff]   ;;  %v886_v47 = vld [vmem:[%s1258_s3 + $0x74] ss:$8 sps:$4 sm:$0xff]  }
  0x10   :  { %632 = vmatprep.subr.bf16.mxu1 %v844_v18  ;;  %673 = vmatprep.subr.bf16.mxu0 %v847_v19  ;;  %v881_v46 = vld [vmem:[%s1258_s3 + $0x160] ss:$8 sps:$4 sm:$0xff]   ;;  %v889_v48 = vld [vmem:[%s1258_s3 + $0x174] ss:$8 sps:$4 sm:$0xff]   ;;  %v884_v49 = vld [vmem:[%s1258_s3 + $0x70] ss:$8 sps:$4 sm:$0xff]  }
  0x11   :  { %v887_v50 = vld [vmem:[%s1258_s3 + $0x170] ss:$8 sps:$4 sm:$0xff]   ;;  %v892_v51 = vld [vmem:[%s1258_s3 + $0x84] ss:$8 sps:$4 sm:$0xff]   ;;  %v890_v53 = vld [vmem:[%s1258_s3 + $0x80] ss:$8 sps:$4 sm:$0xff]  }
  0x12   :  { %746 = vmatmul.mubr.msk.bf16.vlgmr.msra.gmra.mrb[0].mxu0 %vm142_vm0, %v23_v20  ;;  %747 = vmatmul.mubr.msk.bf16.vlgmr.msra.gmra.mrb[0].mxu1 %vm142_vm0, %v23_v20  ;;  %v895_v52 = vld [vmem:[%s1258_s3 + $0x184] ss:$8 sps:$4 sm:$0xff]   ;;  %v893_v54 = vld [vmem:[%s1258_s3 + $0x180] ss:$8 sps:$4 sm:$0xff]   ;;  %v898_v55 = vld [vmem:[%s1258_s3 + $0x94] ss:$8 sps:$4 sm:$0xff]  }
  0x13   :  { %633 = vmatpush1.bf16.msra.mxu1 %v842_v21  ;;  %674 = vmatpush1.bf16.msra.mxu0 %v845_v22  ;;  %v901_v56 = vld [vmem:[%s1258_s3 + $0x194] ss:$8 sps:$4 sm:$0xff]  }
  0x14   :  { %634 = vmatprep.subr.bf16.mxu1 %v850_v23  ;;  %675 = vmatprep.subr.bf16.mxu0 %v853_v24 }
  0x17   :  { %635 = vmatpush1.bf16.msra.mxu1 %v848_v25  ;;  %676 = vmatpush1.bf16.msra.mxu0 %v851_v26 }
  0x18   :  { %636 = vmatprep.subr.bf16.mxu1 %v856_v27  ;;  %677 = vmatprep.subr.bf16.mxu0 %v859_v28 }
  0x1b   :  { %637 = vmatpush1.bf16.msra.mxu1 %v854_v29  ;;  %678 = vmatpush1.bf16.msra.mxu0 %v857_v30 }
  0x1c   :  { %638 = vmatprep.subr.bf16.mxu1 %v862_v31  ;;  %679 = vmatprep.subr.bf16.mxu0 %v865_v32 }
  0x1f   :  { %639 = vmatpush1.bf16.msra.mxu1 %v860_v33  ;;  %680 = vmatpush1.bf16.msra.mxu0 %v863_v34 }
  0x20   :  { %640 = vmatprep.subr.bf16.mxu1 %v868_v35  ;;  %681 = vmatprep.subr.bf16.mxu0 %v871_v36 }
  0x23   :  { %641 = vmatpush1.bf16.msra.mxu1 %v866_v37  ;;  %682 = vmatpush1.bf16.msra.mxu0 %v869_v38 }
  0x24   :  { %642 = vmatprep.subr.bf16.mxu1 %v874_v39  ;;  %683 = vmatprep.subr.bf16.mxu0 %v877_v40 }
  0x27   :  { %643 = vmatpush1.bf16.msra.mxu1 %v872_v41  ;;  %684 = vmatpush1.bf16.msra.mxu0 %v875_v42 }
  0x28   :  { %644 = vmatprep.subr.bf16.mxu1 %v880_v43  ;;  %685 = vmatprep.subr.bf16.mxu0 %v883_v44 }
  0x2b   :  { %645 = vmatpush1.bf16.msra.mxu1 %v878_v45  ;;  %686 = vmatpush1.bf16.msra.mxu0 %v881_v46 }
  0x2c   :  { %646 = vmatprep.subr.bf16.mxu1 %v886_v47  ;;  %687 = vmatprep.subr.bf16.mxu0 %v889_v48 }
  0x2f   :  { %647 = vmatpush1.bf16.msra.mxu1 %v884_v49  ;;  %688 = vmatpush1.bf16.msra.mxu0 %v887_v50 }
  0x30   :  { %648 = vmatprep.subr.bf16.mxu1 %v892_v51  ;;  %689 = vmatprep.subr.bf16.mxu0 %v895_v52 }
  0x31   :  { %10 = vsyncpa [#allocation3], 0  ;;  %v896_v57 = vld [vmem:[%s1258_s3 + $0x90] ss:$8 sps:$4 sm:$0xff]   ;;  %v904_v59 = vld [vmem:[%s1258_s3 + $0xa4] ss:$8 sps:$4 sm:$0xff]   ;;  %v42_v19 = vlaneseq }
  0x32   :  { %v899_v58 = vld [vmem:[%s1258_s3 + $0x190] ss:$8 sps:$4 sm:$0xff]   ;;  %v907_v60 = vld [vmem:[%s1258_s3 + $0x1a4] ss:$8 sps:$4 sm:$0xff]   ;;  %v902_v61 = vld [vmem:[%s1258_s3 + $0xa0] ss:$8 sps:$4 sm:$0xff]  }
  0x33   :  { %649 = vmatpush1.bf16.msra.mxu1 %v890_v53  ;;  %690 = vmatpush1.bf16.msra.mxu0 %v893_v54  ;;  %v905_v62 = vld [vmem:[%s1258_s3 + $0x1a0] ss:$8 sps:$4 sm:$0xff]   ;;  %v910_v63 = vld [vmem:[%s1258_s3 + $0xb4] ss:$8 sps:$4 sm:$0xff]   ;;  %v908_v1 = vld [vmem:[%s1258_s3 + $0xb0] ss:$8 sps:$4 sm:$0xff]  }
  0x34   :  { %650 = vmatprep.subr.bf16.mxu1 %v898_v55  ;;  %691 = vmatprep.subr.bf16.mxu0 %v901_v56  ;;  %v913_v0 = vld [vmem:[%s1258_s3 + $0x1b4] ss:$8 sps:$4 sm:$0xff]   ;;  %v911_v2 = vld [vmem:[%s1258_s3 + $0x1b0] ss:$8 sps:$4 sm:$0xff]   ;;  %v916_v3 = vld [vmem:[%s1258_s3 + $0xc4] ss:$8 sps:$4 sm:$0xff]  }
  0x35   :  { %v919_v4 = vld [vmem:[%s1258_s3 + $0x1c4] ss:$8 sps:$4 sm:$0xff]   ;;  %v914_v5 = vld [vmem:[%s1258_s3 + $0xc0] ss:$8 sps:$4 sm:$0xff]   ;;  %v922_v7 = vld [vmem:[%s1258_s3 + $0xd4] ss:$8 sps:$4 sm:$0xff]  }
  0x36   :  { %v917_v6 = vld [vmem:[%s1258_s3 + $0x1c0] ss:$8 sps:$4 sm:$0xff]   ;;  %v925_v8 = vld [vmem:[%s1258_s3 + $0x1d4] ss:$8 sps:$4 sm:$0xff]   ;;  %v920_v9 = vld [vmem:[%s1258_s3 + $0xd0] ss:$8 sps:$4 sm:$0xff]  }
  0x37   :  { %651 = vmatpush1.bf16.msra.mxu1 %v896_v57  ;;  %692 = vmatpush1.bf16.msra.mxu0 %v899_v58  ;;  %v923_v10 = vld [vmem:[%s1258_s3 + $0x1d0] ss:$8 sps:$4 sm:$0xff]   ;;  %v928_v11 = vld [vmem:[%s1258_s3 + $0xe4] ss:$8 sps:$4 sm:$0xff]   ;;  %v926_v13 = vld [vmem:[%s1258_s3 + $0xe0] ss:$8 sps:$4 sm:$0xff]  }
  0x38   :  { %652 = vmatprep.subr.bf16.mxu1 %v904_v59  ;;  %693 = vmatprep.subr.bf16.mxu0 %v907_v60  ;;  %v931_v12 = vld [vmem:[%s1258_s3 + $0x1e4] ss:$8 sps:$4 sm:$0xff]   ;;  %v929_v14 = vld [vmem:[%s1258_s3 + $0x1e0] ss:$8 sps:$4 sm:$0xff]   ;;  %v934_v15 = vld [vmem:[%s1258_s3 + $0xf4] ss:$8 sps:$4 sm:$0xff]  }
  0x39   :  { %v937_v16 = vld [vmem:[%s1258_s3 + $0x1f4] ss:$8 sps:$4 sm:$0xff]   ;;  %v932_v17 = vld [vmem:[%s1258_s3 + $0xf0] ss:$8 sps:$4 sm:$0xff]   ;;  %v43_v20 = vshrl.u32 %v42_v19, 7  ;;  %s963_s22 = smov [#allocation2]  }
  0x3a   :  { %v935_v18 = vld [vmem:[%s1258_s3 + $0x1f0] ss:$8 sps:$4 sm:$0xff]   ;;  %v40_v23 = vld [vmem:[%s1257_s2] sm:$0xf]  ;;  %s722_s23 = sshll.u32 %s963_s22, 4  ;;  %s723_s23 = int_to_ptr.vmem [resolvable:$true] %s722_s23 }
  0x3b   :  { %653 = vmatpush1.bf16.msra.mxu1 %v902_v61  ;;  %694 = vmatpush1.bf16.msra.mxu0 %v905_v62  ;;  %v44_v21 = vsub.s32 0, %v43_v20  ;;  %v52_v22 = vsub.s32 2, %v43_v20  ;;  %v48_v24 = vsub.s32 1, %v43_v20  ;;  %v56_v25 = vsub.s32 3, %v43_v20  ;;  %v300_v50 = vld [vmem:[%s1259_s4] sm:$0x3]  ;;  %p943_p1 = scmp.lt.s32.totalorder %s723_s23, %s723_s23 }
  0x3c   :  { %654 = vmatprep.subr.bf16.mxu1 %v910_v63  ;;  %695 = vmatprep.subr.bf16.mxu0 %v913_v0  ;;  %s938_s4 = scalar_lea.vmem %s723_s23, 256 }
  0x3d   :  { %v45_v26 = vrot.slane %v40_v23, %v44_v21  ;;  %v53_v27 = vrot.slane %v40_v23, %v52_v22  ;;  %v49_v28 = vrot.slane %v40_v23, %v48_v24  ;;  %v57_v29 = vrot.slane %v40_v23, %v56_v25  ;;  %p939_p0 = scmp.ne.s32.totalorder %s723_s23, %s938_s4  ;;  %p944_p2 = scmp.lt.s32.totalorder %s938_s4, %s938_s4 }
  0x3e   :  { %v305_v51 = vrot.slane %v300_v50, %v44_v21  ;;  %v309_v52 = vrot.slane %v300_v50, %v48_v24 }
  0x3f   :  { %655 = vmatpush1.bf16.msra.mxu1 %v908_v1  ;;  %696 = vmatpush1.bf16.msra.mxu0 %v911_v2  ;;  %p945_p3 = por %p944_p2, %p943_p1 }
  0x40   :  { %656 = vmatprep.subr.bf16.mxu1 %v916_v3  ;;  %697 = vmatprep.subr.bf16.mxu0 %v919_v4 }
  0x41   :  { %p946_p4 = pnand %p945_p3, %p939_p0 }
  0x43   :  { %657 = vmatpush1.bf16.msra.mxu1 %v914_v5  ;;  %698 = vmatpush1.bf16.msra.mxu0 %v917_v6 }
  0x44   :  { %658 = vmatprep.subr.bf16.mxu1 %v922_v7  ;;  %699 = vmatprep.subr.bf16.mxu0 %v925_v8 }
  0x47   :  { %659 = vmatpush1.bf16.msra.mxu1 %v920_v9  ;;  %700 = vmatpush1.bf16.msra.mxu0 %v923_v10 }
  0x48   :  { %660 = vmatprep.subr.bf16.mxu1 %v928_v11  ;;  %701 = vmatprep.subr.bf16.mxu0 %v931_v12 }
  0x4b   :  { %661 = vmatpush1.bf16.msra.mxu1 %v926_v13  ;;  %702 = vmatpush1.bf16.msra.mxu0 %v929_v14 }
  0x4c   :  { %662 = vmatprep.subr.bf16.mxu1 %v934_v15  ;;  %703 = vmatprep.subr.bf16.mxu0 %v937_v16 }
  0x4f   :  { %663 = vmatpush1.bf16.msra.mxu1 %v932_v17  ;;  %704 = vmatpush1.bf16.msra.mxu0 %v935_v18 }
  0xe5   :  { %v180_v30 = vpop.f32.mrb[0].mxu0  ;;  %v221_v31 = vpop.f32.mrb[0].mxu1 }
  0xe6   :  { %v181_v32 = vadd.f32 %v180_v30, %v45_v26  ;;  %v222_v33 = vadd.f32 %v221_v31, %v53_v27  ;;  %v182_v34 = vpop.f32.mrb[1].mxu0  ;;  %v223_v35 = vpop.f32.mrb[1].mxu1 }
  0xe7   :  { %v183_v36 = vadd.f32 %v182_v34, %v49_v28  ;;  %v224_v37 = vadd.f32 %v223_v35, %v57_v29  ;;  %v184_v38 = vpop.f32.mrb[2].mxu0  ;;  %v225_v39 = vpop.f32.mrb[2].mxu1 }
  0xe8   :  { %v228_v40 = vmax.f32 %v181_v32, 0.0  ;;  %v230_v41 = vmax.f32 %v222_v33, 0.0  ;;  %v185_v42 = vpop.f32.mrb[3].mxu0  ;;  %v226_v43 = vpop.f32.mrb[3].mxu1 }
  0xe9   :  { %v229_v44 = vmax.f32 %v183_v36, 0.0  ;;  %v231_v45 = vmax.f32 %v224_v37, 0.0 }
  0xea   :  { %v234_v46 = vpack.c.bf16 %v230_v41, %v230_v41  ;;  %v232_v49 = vpack.c.bf16 %v228_v40, %v228_v40 }
  0xeb   :  { %v233_v47 = vpack.c.bf16 %v229_v44, %v229_v44  ;;  %v235_v48 = vpack.c.bf16 %v231_v45, %v231_v45 }
  0xed   :  { %664 = vmatprep.mubr.bf16.mxu1 %v233_v47  ;;  %705 = vmatprep.mubr.bf16.mxu0 %v235_v48 }
  0xee   :  { %665 = vmatmul.mubr.bf16.vlgmr.msra.gmra.mrb[4].mxu1 %v232_v49  ;;  %706 = vmatmul.mubr.bf16.vlgmr.msra.gmra.mrb[4].mxu0 %v234_v46 }
 0x1c1   :  { %v666_v53 = vpop.f32.mrb[4].mxu1  ;;  %v707_v54 = vpop.f32.mrb[4].mxu0 }
 0x1c2   :  { %v667_v55 = vadd.f32 %v666_v53, %v305_v51  ;;  %v668_v56 = vpop.f32.mrb[5].mxu1  ;;  %v709_v57 = vpop.f32.mrb[5].mxu0 }
 0x1c3   :  { %v669_v58 = vadd.f32 %v668_v56, %v309_v52  ;;  %v670_v59 = vpop.f32.mrb[6].mxu1  ;;  %v711_v60 = vpop.f32.mrb[6].mxu0 }
 0x1c4   :  { %v708_v61 = vadd.f32 %v707_v54, %v667_v55  ;;  %v671_v62 = vpop.f32.mrb[7].mxu1  ;;  %v712_v63 = vpop.f32.mrb[7].mxu0 }
 0x1c5   :  { %v710_v0 = vadd.f32 %v709_v57, %v669_v58 }
 0x1c6   :  { %714 = vst [vmem:[#allocation2] sm:$0xff] %v708_v61 }
 0x1c7   :  { %715 = vst [vmem:[#allocation2 + $0x8] sm:$0xff] %v710_v0 }
 0x1c8   :  { %949 = shalt.err (!%p946_p4)
}
 0x1c9   :  { %s950_s26 = scalar_lea.hbm %s1260_s5, 256 }
 0x1ca   :  { %p951_p5 = scmp.ne.s32.totalorder %s1260_s5, %s950_s26  ;;  %p954_p6 = scmp.lt.u32.totalorder %s950_s26, %s1260_s5 }
 0x1cc   :  { %p956_p7 = pnand %p954_p6, %p951_p5 }
 0x1ce   :  { %959 = shalt.err (!%p956_p7)
}
 0x1cf   :  { %725 = dma.vmem_to_hbm [thread:$0]  %s723_s23, 256, %s1260_s5, [#allocation3]  }
 0x1d0   :  { %960 = dma.done.wait [#allocation3], 256  }
 0x1d1   :  { %961 = vsyncadd [#allocation3], 4294967040 }
 0x1d2   :  { %729 = vsyncpa [#allocation3], 1 }

</bundles_post_ra>
